<compile_context>
chip_gen: v7x
topology: tpu7x:2x2x1
jax: 0.10.0
libtpu: 0.0.40
codegen_flags: <defaults>
</compile_context>

<pallas_src>
import functools
from typing import NamedTuple

import jax
import jax.numpy as jnp
from jax.experimental import pallas as pl
from jax.experimental.pallas import tpu as pltpu


def _round_up(x: int, m: int) -> int:
    return (x + m - 1) // m * m


# ----------------------------------------------------------------------------
# Tile planning (per-generation VMEM budget).
# ----------------------------------------------------------------------------
class _TilePlan(NamedTuple):
    batch: int
    in_features: int
    out_features: int
    tile_b: int
    tile_n: int
    tile_k: int
    b_pad: int
    n_pad: int
    k_pad: int
    w_buffers: int
    vmem_limit_bytes: int


def _vmem_capacity_bytes() -> int:
    try:
        cap = int(pltpu.get_tpu_info().vmem_capacity_bytes)
    except Exception:
        cap = 64 << 20  # conservative: v7x per-TensorCore VMEM
    # Clamp to sane per-core bounds (v7x 64 MiB ... v5e/v6e 128 MiB).
    return max(32 << 20, min(cap, 128 << 20))


def _working_set_bytes(tb: int, tn: int, tk: int, w_bufs: int = 2) -> int:
    x_bytes = 2 * tb * tk * 4        # f32 activations, double-buffered
    w_bytes = w_bufs * tk * tn * 2   # bf16 weight tiles
    o_bytes = 2 * tb * tn * 4        # f32 output, double-buffered
    acc_bytes = tb * tn * 4          # f32 accumulator scratch
    bn_bytes = 2 * 2 * tn * 4        # scale/shift tiles (tiny)
    return x_bytes + w_bytes + o_bytes + acc_bytes + bn_bytes


def make_tile_plan(batch: int, in_features: int, out_features: int) -> _TilePlan:
    cap = _vmem_capacity_bytes()
    ws_budget = int(cap * 0.40)      # double-buffered working set target
    vmem_limit = int(cap * 0.70)     # scoped VMEM limit with headroom

    b8 = _round_up(batch, 8)
    kp = _round_up(in_features, 128)
    np_ = _round_up(out_features, 128)

    # Prefer the whole (padded) out-feature range resident: the j axis collapses
    # to a single step, so x is read and the activation computed exactly once.
    tile_n = np_
    tile_k = min(kp, 2048)
    tile_b = min(b8, 512)

    def fits(tb, tn, tk, wb=2):
        return _working_set_bytes(tb, tn, tk, wb) <= ws_budget

    def half(v, unit):
        return max(unit, (v // 2) // unit * unit)

    # Shrink in priority order (K first, then B, then N) until the budget fits;
    # every tile stays a multiple of (8 sublane, 128 lane).
    while not fits(tile_b, tile_n, tile_k):
        if tile_k > 512:
            tile_k = half(tile_k, 128)
        elif tile_b > 128:
            tile_b = half(tile_b, 8)
        elif tile_n > 512:
            tile_n = half(tile_n, 128)
        elif tile_k > 128:
            tile_k = half(tile_k, 128)
        elif tile_b > 8:
            tile_b = half(tile_b, 8)
        elif tile_n > 128:
            tile_n = half(tile_n, 128)
        else:
            break  # already the smallest legal tiles

    # v7x megacore: ensure the "parallel" (i, j) grid has >= 2 blocks when the
    # problem allows it, otherwise the second TensorCore idles.
    def parallel_blocks(tb, tn):
        return (_round_up(b8, tb) // tb) * (_round_up(np_, tn) // tn)

    if parallel_blocks(tile_b, tile_n) < 2:
        if b8 >= 16:
            tile_b = _round_up(b8 // 2, 8)
        elif np_ >= 256:
            tile_n = _round_up(np_ // 2, 128)

    b_pad = _round_up(b8, tile_b)
    n_pad = _round_up(np_, tile_n)
    k_pad = _round_up(kp, tile_k)

    # Deeper pipeline on the streamed weight operand when the k-loop is long and
    # there is VMEM headroom for a 3rd buffer.
    k_steps = k_pad // tile_k
    w_bufs = 3 if (k_steps >= 4 and fits(tile_b, tile_n, tile_k, 3)) else 2

    return _TilePlan(batch, in_features, out_features, tile_b, tile_n, tile_k,
                     b_pad, n_pad, k_pad, w_bufs, vmem_limit)


# ----------------------------------------------------------------------------
# Kernel.
# ----------------------------------------------------------------------------
def _dense_block_kernel(x_ref, w_ref, scale_ref, shift_ref, o_ref, acc_ref):
    k = pl.program_id(2)
    last_k = pl.num_programs(2) - 1

    # Sigmoid-approximated GELU in f32 (EUP sigmoid + VPU mul), then cast the
    # MXU operand to bf16; accumulation stays f32.
    x = x_ref[...]
    act = (jax.nn.sigmoid(1.702 * x) * x).astype(jnp.bfloat16)
    partial = jnp.dot(act, w_ref[...], preferred_element_type=jnp.float32)

    @pl.when(k == 0)
    def _first():
        # Direct write: avoids a full zero-init store + re-read of the tile.
        acc_ref[...] = partial

    @pl.when(k > 0)
    def _accumulate():
        acc_ref[...] += partial

    @pl.when(k == last_k)
    def _finalize():
        # Folded BatchNorm1d (eval):
        #   y * gamma/sqrt(var+eps) + (beta - mean*gamma/sqrt(var+eps))
        o_ref[...] = (acc_ref[...] * scale_ref[...] + shift_ref[...]).astype(o_ref.dtype)


# ----------------------------------------------------------------------------
# Wrapper: parameter prep is hoisted out of the per-call path.
# ----------------------------------------------------------------------------
def prepare_dense_block_params(w_t, gamma, beta, running_mean, running_var,
                               plan: _TilePlan, eps: float = 1e-3):
    """Fold BN running stats into scale/shift and pad/cast the weight ONCE.

    w_t: (in_features, out_features) f32  (pre-transposed nn.Linear weight).
    Returns (w_padded_bf16, scale_(1,N_pad), shift_(1,N_pad)).
    """
    k_in, n_out = w_t.shape
    inv_std = 1.0 / jnp.sqrt(running_var.astype(jnp.float32) + eps)
    scale = gamma.astype(jnp.float32) * inv_std
    shift = beta.astype(jnp.float32) - running_mean.astype(jnp.float32) * scale

    pad_k = plan.k_pad - k_in
    pad_n = plan.n_pad - n_out
    w_p = w_t
    if pad_k or pad_n:
        # Zero K padding contributes 0 to the dot; padded N columns get
        # scale=shift=0 and are sliced off by the caller.
        w_p = jnp.pad(w_p, ((0, pad_k), (0, pad_n)))
    w_p = w_p.astype(jnp.bfloat16)
    if pad_n:
        scale = jnp.pad(scale, (0, pad_n))
        shift = jnp.pad(shift, (0, pad_n))
    return w_p, scale.reshape(1, plan.n_pad), shift.reshape(1, plan.n_pad)


def dense_block_apply(x, w_p, scale_p, shift_p, plan: _TilePlan,
                      out_dtype=jnp.float32):
    """Per-call forward: x (B, in_features) f32 with prepared (padded) params."""
    b, k_in = x.shape
    pad_b = plan.b_pad - b
    pad_k = plan.k_pad - k_in
    # Skip the pad op entirely when shapes are already tile-aligned.
    x_p = x if (pad_b == 0 and pad_k == 0) else jnp.pad(x, ((0, pad_b), (0, pad_k)))

    grid = (plan.b_pad // plan.tile_b,
            plan.n_pad // plan.tile_n,
            plan.k_pad // plan.tile_k)

    if plan.w_buffers == 2:
        w_spec = pl.BlockSpec((plan.tile_k, plan.tile_n), lambda i, j, k: (k, j))
    else:
        w_spec = pl.BlockSpec((plan.tile_k, plan.tile_n), lambda i, j, k: (k, j),
                              pipeline_mode=pl.Buffered(plan.w_buffers))

    out = pl.pallas_call(
        _dense_block_kernel,
        out_shape=jax.ShapeDtypeStruct((plan.b_pad, plan.n_pad), out_dtype),
        grid=grid,
        in_specs=[
            pl.BlockSpec((plan.tile_b, plan.tile_k), lambda i, j, k: (i, k)),
            w_spec,
            pl.BlockSpec((1, plan.tile_n), lambda i, j, k: (0, j)),
            pl.BlockSpec((1, plan.tile_n), lambda i, j, k: (0, j)),
        ],
        out_specs=pl.BlockSpec((plan.tile_b, plan.tile_n), lambda i, j, k: (i, j)),
        scratch_shapes=[pltpu.VMEM((plan.tile_b, plan.tile_n), jnp.float32)],
        compiler_params=pltpu.CompilerParams(
            dimension_semantics=("parallel", "parallel", "arbitrary"),
            vmem_limit_bytes=plan.vmem_limit_bytes,
        ),
    )(x_p, w_p, scale_p, shift_p)

    return out[:b, :plan.out_features]


def dense_block_forward(x, w_t, gamma, beta, running_mean, running_var,
                        eps=1e-3, out_dtype=jnp.float32):
    """One-shot convenience wrapper (plan + param prep + apply)."""
    b, k_in = x.shape
    n_out = w_t.shape[1]
    plan = make_tile_plan(b, k_in, n_out)
    w_p, scale_p, shift_p = prepare_dense_block_params(
        w_t, gamma, beta, running_mean, running_var, plan, eps)
    return dense_block_apply(x, w_p, scale_p, shift_p, plan, out_dtype)


# ----------------------------------------------------------------------------
# References.
# ----------------------------------------------------------------------------
def _reference_f32(x, w_t, gamma, beta, running_mean, running_var, eps=1e-3):
    act = jax.nn.sigmoid(1.702 * x) * x
    y = act @ w_t
    return (y - running_mean) / jnp.sqrt(running_var + eps) * gamma + beta


def _reference_bf16(x, w_t, gamma, beta, running_mean, running_var, eps=1e-3):
    # Same MXU operand precision as the kernel (bf16 x bf16 -> f32 accumulate).
    act = jax.nn.sigmoid(1.702 * x) * x
    y = jnp.dot(
        act.astype(jnp.bfloat16),
        w_t.astype(jnp.bfloat16),
        preferred_element_type=jnp.float32,
    )
    return (y - running_mean) / jnp.sqrt(running_var + eps) * gamma + beta


if __name__ == "__main__":
    key = jax.random.PRNGKey(0)
    B, in_features, out_features = 8, 32, 64

    k_x, k_w = jax.random.split(key)

    # Deterministic "Keras-default"-style init (kaiming_normal_ for the weight,
    # BN gamma=1, beta=0, running_mean=0, running_var=1).
    x = jax.random.normal(k_x, (B, in_features), dtype=jnp.float32)
    std = (2.0 / in_features) ** 0.5  # kaiming_normal_ fan_in
    w = jax.random.normal(k_w, (out_features, in_features), dtype=jnp.float32) * std
    w_t = w.T  # (in_features, out_features)

    gamma = jnp.ones((out_features,), jnp.float32)
    beta = jnp.zeros((out_features,), jnp.float32)
    running_mean = jnp.zeros((out_features,), jnp.float32)
    running_var = jnp.ones((out_features,), jnp.float32)

    # Hoisted (per-model) prep: tile plan + BN fold + weight pad/cast.
    plan = make_tile_plan(B, in_features, out_features)
    w_p, scale_p, shift_p = prepare_dense_block_params(
        w_t, gamma, beta, running_mean, running_var, plan)

    apply_fn = jax.jit(functools.partial(dense_block_apply, plan=plan))
    out = apply_fn(x, w_p, scale_p, shift_p)
    out = jax.block_until_ready(out)

    # Also exercise the one-shot wrapper path.
    out_oneshot = jax.block_until_ready(
        dense_block_forward(x, w_t, gamma, beta, running_mean, running_var))

    ref_bf16 = _reference_bf16(x, w_t, gamma, beta, running_mean, running_var)
    ref_f32 = _reference_f32(x, w_t, gamma, beta, running_mean, running_var)

    assert out.shape == (B, out_features)
    assert jnp.allclose(out, out_oneshot, atol=1e-6, rtol=1e-6), "wrapper path mismatch"
    # Tight check against a reference using the same bf16 MXU operand precision.
    assert jnp.allclose(out, ref_bf16, atol=1e-4, rtol=1e-4), "mismatch vs bf16 reference"
    # Loose check against the exact f32 module math (bf16 operand rounding only).
    assert jnp.allclose(out, ref_f32, atol=5e-2, rtol=5e-2), "mismatch vs f32 reference"

    print("KERNEL_OK")
</pallas_src>

<mosaic_0001>
module attributes {stable_mosaic.version = 11 : i64} {
  func.func @_dense_block_kernel(%arg0: i32, %arg1: i32, %arg2: i32, %arg3: memref<8x128xf32, #tpu.memory_space<vmem>>, %arg4: memref<128x128xbf16, #tpu.memory_space<vmem>>, %arg5: memref<1x128xf32, #tpu.memory_space<vmem>>, %arg6: memref<1x128xf32, #tpu.memory_space<vmem>>, %arg7: memref<8x128xf32, #tpu.memory_space<vmem>>, %arg8: memref<8x128xf32, #tpu.memory_space<vmem>>) attributes {dimension_semantics = [#tpu.dimension_semantics<parallel>, #tpu.dimension_semantics<parallel>, #tpu.dimension_semantics<arbitrary>], iteration_bounds = array<i64: 1, 1, 1>, scalar_prefetch = 0 : i64, scratch_operands = 1 : i64, tpu.core_type = #tpu.core_type<tc>, window_params = [{transform_indices = @transform_0, window_bounds = array<i64: 8, 128>}, {transform_indices = @transform_1, window_bounds = array<i64: 128, 128>}, {transform_indices = @transform_2, window_bounds = array<i64: 1, 128>}, {transform_indices = @transform_3, window_bounds = array<i64: 1, 128>}, {transform_indices = @transform_4, window_bounds = array<i64: 8, 128>}]} {
    %c0 = arith.constant 0 : index
    %c0_0 = arith.constant 0 : index
    %0 = vector.load %arg3[%c0, %c0_0] : memref<8x128xf32, #tpu.memory_space<vmem>>, vector<8x128xf32>
    %cst = arith.constant 1.702000e+00 : f32
    %1 = vector.broadcast %cst : f32 to vector<8x128xf32>
    %2 = arith.mulf %1, %0 : vector<8x128xf32>
    %3 = arith.negf %2 : vector<8x128xf32>
    %4 = math.exp %3 : vector<8x128xf32>
    %cst_1 = arith.constant 1.000000e+00 : f32
    %5 = vector.broadcast %cst_1 : f32 to vector<8x128xf32>
    %6 = arith.addf %5, %4 : vector<8x128xf32>
    %7 = arith.divf %5, %6 : vector<8x128xf32>
    %8 = arith.mulf %7, %0 : vector<8x128xf32>
    %9 = arith.truncf %8 : vector<8x128xf32> to vector<8x128xbf16>
    %c0_2 = arith.constant 0 : index
    %c0_3 = arith.constant 0 : index
    %10 = vector.load %arg4[%c0_2, %c0_3] : memref<128x128xbf16, #tpu.memory_space<vmem>>, vector<128x128xbf16>
    %cst_4 = arith.constant dense<0.000000e+00> : vector<8x128xf32>
    %11 = tpu.matmul %9, %10, %cst_4 {dimension_numbers = #tpu.dot_dimension_numbers<[1], [0], [0], [1], [0, 0, 1, 1], [], []>} : vector<8x128xbf16>, vector<128x128xbf16>, vector<8x128xf32> -> vector<8x128xf32>
    %c0_i32 = arith.constant 0 : i32
    %12 = arith.cmpi eq, %arg2, %c0_i32 : i32
    %13 = arith.extui %12 : i1 to i32
    %c0_i32_5 = arith.constant 0 : i32
    %14 = arith.cmpi ne, %13, %c0_i32_5 : i32
    scf.if %14 {
      %c0_10 = arith.constant 0 : index
      %c0_11 = arith.constant 0 : index
      %21 = vector.load %arg8[%c0_10, %c0_11] : memref<8x128xf32, #tpu.memory_space<vmem>>, vector<8x128xf32>
      tpu.vector_store %arg8[%c0_10, %c0_11], %11 {strides = array<i32>} : memref<8x128xf32, #tpu.memory_space<vmem>>, vector<8x128xf32>,
    } else {
    }
    %c0_i32_6 = arith.constant 0 : i32
    %15 = arith.cmpi sgt, %arg2, %c0_i32_6 : i32
    %16 = arith.extui %15 : i1 to i32
    %c0_i32_7 = arith.constant 0 : i32
    %17 = arith.cmpi ne, %16, %c0_i32_7 : i32
    scf.if %17 {
      %c0_10 = arith.constant 0 : index
      %c0_11 = arith.constant 0 : index
      %21 = vector.load %arg8[%c0_10, %c0_11] : memref<8x128xf32, #tpu.memory_space<vmem>>, vector<8x128xf32>
      %22 = arith.addf %21, %11 : vector<8x128xf32>
      %c0_12 = arith.constant 0 : index
      %c0_13 = arith.constant 0 : index
      %23 = vector.load %arg8[%c0_12, %c0_13] : memref<8x128xf32, #tpu.memory_space<vmem>>, vector<8x128xf32>
      tpu.vector_store %arg8[%c0_12, %c0_13], %22 {strides = array<i32>} : memref<8x128xf32, #tpu.memory_space<vmem>>, vector<8x128xf32>,
    } else {
    }
    %c0_i32_8 = arith.constant 0 : i32
    %18 = arith.cmpi eq, %arg2, %c0_i32_8 : i32
    %19 = arith.extui %18 : i1 to i32
    %c0_i32_9 = arith.constant 0 : i32
    %20 = arith.cmpi ne, %19, %c0_i32_9 : i32
    scf.if %20 {
      %c0_10 = arith.constant 0 : index
      %c0_11 = arith.constant 0 : index
      %21 = vector.load %arg8[%c0_10, %c0_11] : memref<8x128xf32, #tpu.memory_space<vmem>>, vector<8x128xf32>
      %c0_12 = arith.constant 0 : index
      %c0_13 = arith.constant 0 : index
      %22 = vector.load %arg5[%c0_12, %c0_13] : memref<1x128xf32, #tpu.memory_space<vmem>>, vector<1x128xf32>
      %23 = vector.broadcast %22 : vector<1x128xf32> to vector<8x128xf32>
      %24 = arith.mulf %21, %23 : vector<8x128xf32>
      %c0_14 = arith.constant 0 : index
      %c0_15 = arith.constant 0 : index
      %25 = vector.load %arg6[%c0_14, %c0_15] : memref<1x128xf32, #tpu.memory_space<vmem>>, vector<1x128xf32>
      %26 = vector.broadcast %25 : vector<1x128xf32> to vector<8x128xf32>
      %27 = arith.addf %24, %26 : vector<8x128xf32>
      %c0_16 = arith.constant 0 : index
      %c0_17 = arith.constant 0 : index
      %28 = vector.load %arg7[%c0_16, %c0_17] : memref<8x128xf32, #tpu.memory_space<vmem>>, vector<8x128xf32>
      tpu.vector_store %arg7[%c0_16, %c0_17], %27 {strides = array<i32>} : memref<8x128xf32, #tpu.memory_space<vmem>>, vector<8x128xf32>,
    } else {
    }
    return
  }
  func.func @transform_0(%arg0: i32, %arg1: i32, %arg2: i32) -> (i32, i32) {
    %c0_i32 = arith.constant 0 : i32
    return %arg0, %arg2 : i32, i32
  }
  func.func @transform_1(%arg0: i32, %arg1: i32, %arg2: i32) -> (i32, i32) {
    %c0_i32 = arith.constant 0 : i32
    return %arg2, %arg1 : i32, i32
  }
  func.func @transform_2(%arg0: i32, %arg1: i32, %arg2: i32) -> (i32, i32) {
    %c0_i32 = arith.constant 0 : i32
    %c0_i32_0 = arith.constant 0 : i32
    return %c0_i32, %arg1 : i32, i32
  }
  func.func @transform_3(%arg0: i32, %arg1: i32, %arg2: i32) -> (i32, i32) {
    %c0_i32 = arith.constant 0 : i32
    %c0_i32_0 = arith.constant 0 : i32
    return %c0_i32, %arg1 : i32, i32
  }
  func.func @transform_4(%arg0: i32, %arg1: i32, %arg2: i32) -> (i32, i32) {
    %c0_i32 = arith.constant 0 : i32
    return %arg0, %arg1 : i32, i32
  }
}

</mosaic_0001>

<bundles_post_ra>
// kernel: dense_block_apply.1
= control target key start
LH: loop header
LB: loop body
LE: loop exit
PB: predicated region body
PF: predicated region fallthrough
CT: control target
= control target key end

     0   :  { %9 = vsyncpa [#allocation4], 0  ;;  %s365_s0 = inlined_call_operand.vmem [shape: f32[8,128], index: 0, kind: input, shape index: {}]   ;;  %s366_s1 = inlined_call_operand.hbm [shape: bf16[128,128], index: 1, kind: input, shape index: {}]   ;;  %s367_s2 = inlined_call_operand.vmem [shape: f32[1,128], index: 2, kind: input, shape index: {}]   ;;  %s368_s3 = inlined_call_operand.vmem [shape: f32[1,128], index: 3, kind: input, shape index: {}]   ;;  %s369_s4 = inlined_call_operand.hbm [shape: f32[8,128], index: 4, kind: output, shape index: {}]  }
   0x1   :  { %10 = vsyncpa [#allocation5], 0  ;;  %s301_s15 = smov [#allocation3]   ;;  %s253_s19 = scalar_lea.hbm %s366_s1, 1024 }
   0x2   :  { %s18_s16 = sshll.u32 %s301_s15, 4  ;;  %p254_p0 = scmp.ne.s32.totalorder %s366_s1, %s253_s19  ;;  %s19_s16 = int_to_ptr.vmem [resolvable:$true] %s18_s16 }
   0x3   :  { %p257_p1 = scmp.lt.u32.totalorder %s253_s19, %s366_s1 }
   0x5   :  { %p259_p2 = pnand %p257_p1, %p254_p0 }
   0x7   :  { %262 = shalt.err (!%p259_p2)
}
   0x8   :  { %s263_s24 = scalar_lea.vmem %s19_s16, 1024  ;;  %p268_p4 = scmp.lt.s32.totalorder %s19_s16, %s19_s16 }
   0x9   :  { %p264_p3 = scmp.ne.s32.totalorder %s19_s16, %s263_s24  ;;  %p269_p5 = scmp.lt.s32.totalorder %s263_s24, %s263_s24 }
   0xb   :  { %p270_p6 = por %p269_p5, %p268_p4 }
   0xd   :  { %p271_p7 = pnand %p270_p6, %p264_p3 }
   0xf   :  { %274 = shalt.err (!%p271_p7)
}
  0x10   :  { %s302_s25 = smov 64   ;;  %s303_s26 = smov 4  }
  0x11   :  { %24 = dma.hbm_to_vmem [thread:$0]  %s366_s1, 1024, %s19_s16, [#allocation4], %s302_s25, %s302_s25, %s303_s26  }
  0x12   :  { %297 = dma.done.wait [#allocation4], 1024  }
  0x13   :  { %298 = vsyncadd [#allocation4], 4294966272  ;;  %v304_v0 = vmov 0.0   ;;  %vm305_vm0 = vmmov 0   ;;  %v241_v1 = vld [vmem:[#allocation3] sm:$0xff]   ;;  %v242_v2 = vld [vmem:[#allocation3 + $0x8] sm:$0xff]  }
  0x14   :  { %215 = vmatprep.subr.bf16.mxu0 %v304_v0  ;;  %231 = vmatprep.mubr.msk.bf16.mxu0 %vm305_vm0, %v304_v0  ;;  %v243_v3 = vld [vmem:[#allocation3 + $0x10] sm:$0xff]   ;;  %v33_v4 = vld [vmem:[%s365_s0] sm:$0xff]  ;;  %v245_v8 = vld [vmem:[#allocation3 + $0x20] sm:$0xff]   ;;  %s306_s7 = smov [#allocation6]  }
  0x15   :  { %216 = vmatpush3.bf16.msra.mxu0 %v241_v1  ;;  %v195_v5 = vmul.f32 -1.702, %v33_v4  ;;  %v244_v6 = vld [vmem:[#allocation3 + $0x18] sm:$0xff]   ;;  %v246_v9 = vld [vmem:[#allocation3 + $0x28] sm:$0xff]   ;;  %v247_v10 = vld [vmem:[#allocation3 + $0x30] sm:$0xff]   ;;  %s186_s8 = sshll.u32 %s306_s7, 4  ;;  %s187_s8 = int_to_ptr.vmem [resolvable:$true] %s186_s8 }
  0x16   :  { %217 = vmatprep.subr.bf16.mxu0 %v304_v0  ;;  %v248_v13 = vld [vmem:[#allocation3 + $0x38] sm:$0xff]   ;;  %s275_s9 = scalar_lea.vmem %s187_s8, 128  ;;  %p280_p9 = scmp.lt.s32.totalorder %s187_s8, %s187_s8 }
  0x17   :  { %v36_v7 = vmul.f32 1.442695, %v195_v5  ;;  %v204_v17 = vld [vmem:[%s367_s2] ss:$0 sm:$0xff]  ;;  %p276_p8 = scmp.ne.s32.totalorder %s187_s8, %s275_s9  ;;  %p281_p10 = scmp.lt.s32.totalorder %s275_s9, %s275_s9 }
  0x18   :  { %v205_v19 = vld [vmem:[%s368_s3] ss:$0 sm:$0xff] }
  0x19   :  { %218 = vmatpush3.bf16.msra.mxu0 %v242_v2  ;;  %249 = vpow2.f32 %v36_v7  ;;  %p282_p11 = por %p281_p10, %p280_p9 }
  0x1a   :  { %219 = vmatprep.subr.bf16.mxu0 %v304_v0 }
  0x1b   :  { %p283_p12 = pnand %p282_p11, %p276_p8 }
  0x1d   :  { %220 = vmatpush3.bf16.msra.mxu0 %v243_v3 }
  0x1e   :  { %221 = vmatprep.subr.bf16.mxu0 %v304_v0 }
  0x21   :  { %222 = vmatpush3.bf16.msra.mxu0 %v244_v6 }
  0x22   :  { %223 = vmatprep.subr.bf16.mxu0 %v304_v0 }
  0x23   :  { %v250_v11 = vpop.eup %249 }
  0x24   :  { %v38_v12 = vadd.f32 1.0, %v250_v11 }
  0x25   :  { %224 = vmatpush3.bf16.msra.mxu0 %v245_v8 }
  0x26   :  { %225 = vmatprep.subr.bf16.mxu0 %v304_v0  ;;  %251 = vrcp.f32 %v38_v12 }
  0x29   :  { %226 = vmatpush3.bf16.msra.mxu0 %v246_v9 }
  0x2a   :  { %227 = vmatprep.subr.bf16.mxu0 %v304_v0 }
  0x2d   :  { %228 = vmatpush3.bf16.msra.mxu0 %v247_v10 }
  0x2e   :  { %229 = vmatprep.subr.bf16.mxu0 %v304_v0 }
  0x30   :  { %v252_v14 = vpop.eup %251 }
  0x31   :  { %230 = vmatpush3.bf16.msra.mxu0 %v248_v13  ;;  %v41_v15 = vmul.f32 %v252_v14, %v33_v4 }
  0x33   :  { %v42_v16 = vpack.c.bf16 %v41_v15, %v41_v15 }
  0x35   :  { %232 = vmatmul.mubr.bf16.vlgmr.msra.gmra.mrb[0].mxu0 %v42_v16 }
 0x108   :  { %v141_v18 = vpop.f32.mrb[0].mxu0 }
 0x109   :  { %v170_v20 = vmul.f32 %v204_v17, %v141_v18  ;;  %v233_v21 = vpop.f32.mrb[1].mxu0 }
 0x10a   :  { %v144_v22 = vpop.f32.mrb[2].mxu0 }
 0x10b   :  { %v178_v23 = vadd.f32 %v205_v19, %v170_v20  ;;  %v234_v24 = vpop.f32.mrb[3].mxu0 }
 0x10d   :  { %179 = vst [vmem:[#allocation6] sm:$0xff] %v178_v23 }
 0x10e   :  { %286 = shalt.err (!%p283_p12)
}
 0x10f   :  { %s287_s3 = scalar_lea.hbm %s369_s4, 128 }
 0x110   :  { %p288_p13 = scmp.ne.s32.totalorder %s369_s4, %s287_s3  ;;  %p291_p0 = scmp.lt.u32.totalorder %s287_s3, %s369_s4 }
 0x112   :  { %p293_p1 = pnand %p291_p0, %p288_p13 }
 0x114   :  { %296 = shalt.err (!%p293_p1)
}
 0x115   :  { %189 = dma.vmem_to_hbm [thread:$0]  %s187_s8, 128, %s369_s4, [#allocation5]  }
 0x116   :  { %299 = dma.done.wait [#allocation5], 128  }
 0x117   :  { %300 = vsyncadd [#allocation5], 4294967168 }
 0x118   :  { %193 = vsyncpa [#allocation4], 1 }
 0x119   :  { %194 = vsyncpa [#allocation5], 1 }

</bundles_post_ra>
